<compile_context>
chip_gen: v6e
topology: v6e:2x2x1
jax: 0.10.0
libtpu: 0.0.40
codegen_flags: <defaults>
</compile_context>

<pallas_src>
import jax
import jax.numpy as jnp
from jax.experimental import pallas as pl
from jax.experimental.pallas import tpu as pltpu


def _round_up(x, m):
    return ((x + m - 1) // m) * m


# Conservative per-TensorCore VMEM budgets (v7x: 64 MiB/TC; v5e/v6e: 128 MiB).
_VMEM_BUDGET = 56 << 20
_WEIGHT_BUDGET = 40 << 20


def _box_class_kernel(x_ref, w_ref, b_ref, o_ref):
    """One (N-tile, class-tile): out = x @ W^T[:, tile] + b[tile].

    Single MXU matmul, f32 accumulation.  If the weight is stored narrower
    than x (e.g. bf16 weights, f32 activations) x is cast in-kernel, avoiding
    an extra HBM pass from a wrapper-side astype.
    """
    x = x_ref[...]
    w = w_ref[...]
    if x.dtype != w.dtype:
        x = x.astype(w.dtype)
    o_ref[...] = (
        jnp.dot(x, w, preferred_element_type=jnp.float32) + b_ref[...]
    ).astype(o_ref.dtype)


def prepare_box_class_params(weight, bias, *, weight_dtype=None):
    """One-time parameter prep (call at model init, NOT per forward call).

    Args:
      weight: (num_classes, K)  -- PyTorch nn.Linear weight layout.
      bias:   (num_classes,)
      weight_dtype: optional storage dtype for the kernel weight
        (e.g. jnp.bfloat16 on v5e/v6e for halved HBM/VMEM footprint).
    Returns:
      w_t (K, c_pad), b2d (1, c_pad) f32, num_classes.
    """
    num_classes, k_dim = weight.shape
    c_pad = _round_up(max(num_classes, 1), 128)      # lane-dense output
    wdt = jnp.dtype(weight_dtype) if weight_dtype is not None else weight.dtype
    # TODO(synk): if K is not a multiple of 256, also zero-pad K here (and the
    # flattened x view) for fully aligned MXU passes; minor since mem-bound.
    w_t = (
        jnp.zeros((k_dim, c_pad), dtype=wdt)
        .at[:, :num_classes]
        .set(weight.T.astype(wdt))
    )
    b2d = (
        jnp.zeros((1, c_pad), dtype=jnp.float32)
        .at[0, :num_classes]
        .set(bias.astype(jnp.float32))
    )
    return w_t, b2d, num_classes


def box_class_output_forward(x, w_t, b2d, num_classes, *, tn=512):
    """
    Args:
      x:   (N, C, H, W) or (N, K) per-region features.
      w_t: (K, c_pad) prepared transposed weight (prepare_box_class_params).
      b2d: (1, c_pad) prepared f32 bias.
      num_classes: logical class count (c_pad is its 128-multiple pad).
      tn:  requested N-tile size (auto-clamped to VMEM / N / sublane rules).
    Returns:
      scores: (N, num_classes), dtype of x.
    """
    out_dtype = x.dtype
    if x.ndim > 2:
        x = x.reshape(x.shape[0], -1)                # torch.flatten(x, 1)
    n, k_dim = x.shape
    k_w, c_pad = w_t.shape
    assert k_w == k_dim, (k_w, k_dim)

    x_isz = jnp.dtype(x.dtype).itemsize
    w_isz = jnp.dtype(w_t.dtype).itemsize
    o_isz = jnp.dtype(out_dtype).itemsize

    # ---- class tiling: prefer the whole W^T resident in VMEM (1 buffer) ----
    if k_dim * c_pad * w_isz <= _WEIGHT_BUDGET:
        tc, w_bufs = c_pad, 1                        # fetched once, revisited
    else:
        tc = max(128, min(c_pad, (_WEIGHT_BUDGET // (2 * k_dim * w_isz)) // 128 * 128))
        while c_pad % tc:                            # tc must divide c_pad
            tc -= 128
        w_bufs = 2 if 2 * k_dim * tc * w_isz <= _WEIGHT_BUDGET else 1
        # TODO(synk): if even one (K, 128) weight tile blows VMEM (enormous K),
        # add a K-reduction grid axis with an f32 VMEM accumulator.
    w_bytes = w_bufs * (k_dim * tc * w_isz + 8 * tc * 4)   # weight + padded bias

    # ---- N tiling against the remaining VMEM budget ------------------------
    rem = max(_VMEM_BUDGET - w_bytes, 1 << 20)
    per_row = 2 * k_dim * x_isz + 2 * tc * o_isz     # double-buffered x & out
    tn_fit = max(16, (rem // per_row) // 16 * 16)
    tn = max(16, min(_round_up(tn, 16), tn_fit))     # sublane-legal, user cap
    # Keep >= 2 N-steps when N allows so "parallel" spans both v7x TensorCores.
    tn = min(tn, max(16, _round_up(pl.cdiv(n, 2), 16)))

    grid = (pl.cdiv(n, tn), c_pad // tc)             # ragged last N block OK

    total_bytes = w_bytes + tn * per_row
    vmem_limit = int(max(32 << 20, total_bytes + (2 << 20)))

    w_kw = {"pipeline_mode": pl.Buffered(1)} if w_bufs == 1 else {}

    out = pl.pallas_call(
        _box_class_kernel,
        out_shape=jax.ShapeDtypeStruct((n, c_pad), out_dtype),
        grid_spec=pltpu.PrefetchScalarGridSpec(
            num_scalar_prefetch=0,
            grid=grid,
            in_specs=[
                pl.BlockSpec((tn, k_dim), lambda i, j: (i, 0)),          # x tile
                pl.BlockSpec((k_dim, tc), lambda i, j: (0, j), **w_kw),  # W^T
                pl.BlockSpec((1, tc), lambda i, j: (0, j), **w_kw),      # bias
            ],
            out_specs=pl.BlockSpec((tn, tc), lambda i, j: (i, j)),
        ),
        compiler_params=pltpu.CompilerParams(
            dimension_semantics=("parallel", "parallel"),
            vmem_limit_bytes=vmem_limit,
        ),
    )(x, w_t, b2d)

    return out[:, :num_classes]


if __name__ == "__main__":
    # Small shapes consistent with the module: per-region (ROI-pooled) features.
    N, C, H, W = 2, 4, 16, 16            # input_size = 4*16*16 = 1024
    NUM_CLASSES = 6

    key = jax.random.PRNGKey(0)
    kx, kw = jax.random.split(key)

    x = jax.random.normal(kx, (N, C, H, W), dtype=jnp.float32)

    # Parameter init matching the module's __init__:
    #   nn.init.normal_(self.cls_score.weight, std=0.01)
    #   nn.init.constant_(self.cls_score.bias, 0)
    weight = 0.01 * jax.random.normal(kw, (NUM_CLASSES, C * H * W), dtype=jnp.float32)
    bias = jnp.zeros((NUM_CLASSES,), dtype=jnp.float32)

    ref = x.reshape(N, -1) @ weight.T + bias

    # f32 path: strict correctness check.
    w_t, b2d, nc = prepare_box_class_params(weight, bias)
    scores = jax.block_until_ready(box_class_output_forward(x, w_t, b2d, nc))
    assert scores.shape == (N, NUM_CLASSES)
    assert jnp.allclose(scores, ref, atol=1e-4, rtol=1e-4)

    # bf16-weight path (v5e/v6e perf option): weight stored bf16 at prep time,
    # x cast in-kernel, f32 accumulation.  Loose tolerance vs f32 ref.
    w_t16, b2d16, nc16 = prepare_box_class_params(
        weight, bias, weight_dtype=jnp.bfloat16
    )
    scores16 = jax.block_until_ready(
        box_class_output_forward(x, w_t16, b2d16, nc16)
    )
    assert scores16.shape == (N, NUM_CLASSES)
    assert jnp.allclose(scores16, ref, atol=5e-2, rtol=5e-2)

    print("KERNEL_OK")
</pallas_src>

<mosaic_0001>
module attributes {stable_mosaic.version = 11 : i64} {
  func.func @_box_class_kernel(%arg0: i32, %arg1: i32, %arg2: memref<16x1024xf32, #tpu.memory_space<vmem>>, %arg3: memref<1024x128xf32, #tpu.memory_space<vmem>>, %arg4: memref<1x128xf32, #tpu.memory_space<vmem>>, %arg5: memref<16x128xf32, #tpu.memory_space<vmem>>) attributes {dimension_semantics = [#tpu.dimension_semantics<parallel>, #tpu.dimension_semantics<parallel>], iteration_bounds = array<i64: 1, 1>, scalar_prefetch = 0 : i64, scratch_operands = 0 : i64, tpu.core_type = #tpu.core_type<tc>, window_params = [{transform_indices = @transform_0, window_bounds = array<i64: 16, 1024>}, {pipeline_mode = #tpu.pipeline_mode<synchronous>, transform_indices = @transform_1, window_bounds = array<i64: 1024, 128>}, {pipeline_mode = #tpu.pipeline_mode<synchronous>, transform_indices = @transform_2, window_bounds = array<i64: 1, 128>}, {transform_indices = @transform_3, window_bounds = array<i64: 16, 128>}]} {
    %c0 = arith.constant 0 : index
    %c0_0 = arith.constant 0 : index
    %0 = vector.load %arg2[%c0, %c0_0] : memref<16x1024xf32, #tpu.memory_space<vmem>>, vector<16x1024xf32>
    %c0_1 = arith.constant 0 : index
    %c0_2 = arith.constant 0 : index
    %1 = vector.load %arg3[%c0_1, %c0_2] : memref<1024x128xf32, #tpu.memory_space<vmem>>, vector<1024x128xf32>
    %cst = arith.constant dense<0.000000e+00> : vector<16x128xf32>
    %2 = tpu.matmul %0, %1, %cst {dimension_numbers = #tpu.dot_dimension_numbers<[1], [0], [0], [1], [0, 0, 1, 1], [], []>} : vector<16x1024xf32>, vector<1024x128xf32>, vector<16x128xf32> -> vector<16x128xf32>
    %c0_3 = arith.constant 0 : index
    %c0_4 = arith.constant 0 : index
    %3 = vector.load %arg4[%c0_3, %c0_4] : memref<1x128xf32, #tpu.memory_space<vmem>>, vector<1x128xf32>
    %4 = vector.broadcast %3 : vector<1x128xf32> to vector<16x128xf32>
    %5 = arith.addf %2, %4 : vector<16x128xf32>
    %c0_5 = arith.constant 0 : index
    %c0_6 = arith.constant 0 : index
    %6 = vector.load %arg5[%c0_5, %c0_6] : memref<16x128xf32, #tpu.memory_space<vmem>>, vector<16x128xf32>
    tpu.vector_store %arg5[%c0_5, %c0_6], %5 {strides = array<i32>} : memref<16x128xf32, #tpu.memory_space<vmem>>, vector<16x128xf32>,
    return
  }
  func.func @transform_0(%arg0: i32, %arg1: i32) -> (i32, i32) {
    %c0_i32 = arith.constant 0 : i32
    %c0_i32_0 = arith.constant 0 : i32
    return %arg0, %c0_i32 : i32, i32
  }
  func.func @transform_1(%arg0: i32, %arg1: i32) -> (i32, i32) {
    %c0_i32 = arith.constant 0 : i32
    %c0_i32_0 = arith.constant 0 : i32
    return %c0_i32, %arg1 : i32, i32
  }
  func.func @transform_2(%arg0: i32, %arg1: i32) -> (i32, i32) {
    %c0_i32 = arith.constant 0 : i32
    %c0_i32_0 = arith.constant 0 : i32
    return %c0_i32, %arg1 : i32, i32
  }
  func.func @transform_3(%arg0: i32, %arg1: i32) -> (i32, i32) {
    %c0_i32 = arith.constant 0 : i32
    return %arg0, %arg1 : i32, i32
  }
}

</mosaic_0001>

<bundles_post_ra>
// kernel: tpu_custom_call.1
= control target key start
LH: loop header
LB: loop body
LE: loop exit
PB: predicated region body
PF: predicated region fallthrough
CT: control target
= control target key end

     0   :  { %8 = vsyncpa [#allocation3], 0  ;;  %s1003_s0 = inlined_call_operand.hbm [shape: f32[2,1024], index: 0, kind: input, shape index: {}]   ;;  %s1004_s1 = inlined_call_operand.hbm [shape: f32[1024,128], index: 1, kind: input, shape index: {}]   ;;  %s1005_s2 = inlined_call_operand.vmem [shape: f32[1,128], index: 2, kind: input, shape index: {}]   ;;  %s1006_s3 = inlined_call_operand.hbm [shape: f32[2,128], index: 3, kind: output, shape index: {}]  }
   0x1   :  { %9 = vsyncpa [#allocation6], 0 }
   0x2   :  { %10 = vsyncpa [#allocation4], 0 }
   0x3   :  { %15 = vsyncadd [#allocation3], 1792  ;;  %s943_s12 = smov [#allocation2]  }
   0x4   :  { %s16_s13 = sshll.u32 %s943_s12, 4  ;;  %s17_s13 = int_to_ptr.vmem [resolvable:$true] %s16_s13 }
   0x5   :  { %s885_s14 = scalar_lea.vmem %s17_s13, 256  ;;  %s889_s15 = scalar_lea.vmem %s17_s13, 2048 }
   0x6   :  { %p886_p0 = scmp.ne.s32.totalorder %s17_s13, %s885_s14  ;;  %p890_p1 = scmp.lt.s32.totalorder %s17_s13, %s17_s13 }
   0x7   :  { %p891_p2 = scmp.lt.s32.totalorder %s889_s15, %s885_s14 }
   0x9   :  { %p892_p3 = por %p891_p2, %p890_p1 }
   0xb   :  { %p893_p4 = pnand %p892_p3, %p886_p0 }
   0xd   :  { %896 = shalt.err (!%p893_p4)
}
   0xe   :  { %s944_s16 = smov 256   ;;  %s945_s17 = smov 16  }
   0xf   :  { %22 = dma.hbm_to_vmem [thread:$0]  %s1003_s0, 256, %s17_s13, [#allocation3], %s944_s16, %s944_s16, %s945_s17  }
  0x10   :  { %s946_s20 = smov [#allocation5]  }
  0x11   :  { %s28_s21 = sshll.u32 %s946_s20, 4  ;;  %s29_s21 = int_to_ptr.vmem [resolvable:$true] %s28_s21 }
  0x12   :  { %s905_s22 = scalar_lea.vmem %s29_s21, 16384  ;;  %p910_p6 = scmp.lt.s32.totalorder %s29_s21, %s29_s21 }
  0x13   :  { %p906_p5 = scmp.ne.s32.totalorder %s29_s21, %s905_s22  ;;  %p911_p7 = scmp.lt.s32.totalorder %s905_s22, %s905_s22 }
  0x15   :  { %p912_p8 = por %p911_p7, %p910_p6 }
  0x17   :  { %p913_p9 = pnand %p912_p8, %p906_p5 }
  0x19   :  { %916 = shalt.err (!%p913_p9)
}
  0x1a   :  { %s947_s23 = smov 128   ;;  %s948_s24 = smov 8  }
  0x1b   :  { %34 = dma.hbm_to_vmem [thread:$0]  %s1004_s1, 16384, %s29_s21, [#allocation6], %s947_s23, %s947_s23, %s948_s24  }
  0x1c   :  { %937 = dma.done.wait [#allocation3], 2048  }
  0x1d   :  { %938 = vsyncadd [#allocation3], 4294965248 }
  0x1e   :  { %939 = dma.done.wait [#allocation6], 16384  }
  0x1f   :  { %940 = vsyncadd [#allocation6], 4294950912  ;;  %v90_v0 = vld [vmem:[#allocation5 + $0xf8] sm:$0xff]  ;;  %v89_v4 = vld [vmem:[#allocation5 + $0xf0] sm:$0xff]  ;;  %v949_v30 = vmov 1983009808   ;;  %v217_v32 = vlaneseq }
  0x20   :  { %v122_v1 = vld [vmem:[#allocation5 + $0x1f8] sm:$0xff]  ;;  %691 = vmatprep.subr.mxu0 %v90_v0  ;;  %v121_v5 = vld [vmem:[#allocation5 + $0x1f0] sm:$0xff]  ;;  %v88_v8 = vld [vmem:[#allocation5 + $0xe8] sm:$0xff]  ;;  %v215_v31 = vunpack.c.l.s4 %v949_v30 }
  0x21   :  { %v74_v2 = vld [vmem:[#allocation5 + $0x78] sm:$0xff]  ;;  %729 = vmatprep.subr.mxu1 %v122_v1  ;;  %v73_v6 = vld [vmem:[#allocation5 + $0x70] sm:$0xff]  ;;  %v120_v9 = vld [vmem:[#allocation5 + $0x1e8] sm:$0xff]  ;;  %v218_v42 = vshrl.u32 %v217_v32, 7 }
  0x22   :  { %v106_v3 = vld [vmem:[#allocation5 + $0x178] sm:$0xff]  ;;  %692 = vmatpush3.msra.mxu0 %v74_v2  ;;  %v105_v7 = vld [vmem:[#allocation5 + $0x170] sm:$0xff]  ;;  %v72_v10 = vld [vmem:[#allocation5 + $0x68] sm:$0xff]  ;;  %v216_v41 = vunpack.c.0.s8 %v215_v31 }
  0x23   :  { %730 = vmatpush3.msra.mxu1 %v106_v3  ;;  %693 = vmatprep.subr.mxu0 %v89_v4  ;;  %v104_v11 = vld [vmem:[#allocation5 + $0x168] sm:$0xff]  ;;  %v87_v12 = vld [vmem:[#allocation5 + $0xe0] sm:$0xff]  ;;  %v86_v16 = vld [vmem:[#allocation5 + $0xd8] sm:$0xff] }
  0x24   :  { %731 = vmatprep.subr.mxu1 %v121_v5  ;;  %694 = vmatpush3.msra.mxu0 %v73_v6  ;;  %v119_v13 = vld [vmem:[#allocation5 + $0x1e0] sm:$0xff]  ;;  %v118_v17 = vld [vmem:[#allocation5 + $0x1d8] sm:$0xff]  ;;  %v85_v20 = vld [vmem:[#allocation5 + $0xd0] sm:$0xff]  ;;  %v979_v55 = vsub.s32 %v216_v41, %v218_v42 }
  0x25   :  { %732 = vmatpush3.msra.mxu1 %v105_v7  ;;  %695 = vmatprep.subr.mxu0 %v88_v8  ;;  %v71_v14 = vld [vmem:[#allocation5 + $0x60] sm:$0xff]  ;;  %v70_v18 = vld [vmem:[#allocation5 + $0x58] sm:$0xff]  ;;  %v117_v21 = vld [vmem:[#allocation5 + $0x1d0] sm:$0xff] }
  0x26   :  { %733 = vmatprep.subr.mxu1 %v120_v9  ;;  %v103_v15 = vld [vmem:[#allocation5 + $0x160] sm:$0xff]  ;;  %696 = vmatpush3.msra.mxu0 %v72_v10  ;;  %v102_v19 = vld [vmem:[#allocation5 + $0x158] sm:$0xff]  ;;  %v69_v22 = vld [vmem:[#allocation5 + $0x50] sm:$0xff] }
  0x27   :  { %734 = vmatpush3.msra.mxu1 %v104_v11  ;;  %697 = vmatprep.subr.mxu0 %v87_v12  ;;  %v101_v23 = vld [vmem:[#allocation5 + $0x150] sm:$0xff]  ;;  %v84_v24 = vld [vmem:[#allocation5 + $0xc8] sm:$0xff]  ;;  %v83_v28 = vld [vmem:[#allocation5 + $0xc0] sm:$0xff] }
  0x28   :  { %735 = vmatprep.subr.mxu1 %v119_v13  ;;  %698 = vmatpush3.msra.mxu0 %v71_v14  ;;  %v116_v25 = vld [vmem:[#allocation5 + $0x1c8] sm:$0xff]  ;;  %v115_v29 = vld [vmem:[#allocation5 + $0x1c0] sm:$0xff]  ;;  %v82_v35 = vld [vmem:[#allocation5 + $0xb8] sm:$0xff] }
  0x29   :  { %736 = vmatpush3.msra.mxu1 %v103_v15  ;;  %699 = vmatprep.subr.mxu0 %v86_v16  ;;  %v68_v26 = vld [vmem:[#allocation5 + $0x48] sm:$0xff]  ;;  %v67_v33 = vld [vmem:[#allocation5 + $0x40] sm:$0xff]  ;;  %v114_v36 = vld [vmem:[#allocation5 + $0x1b8] sm:$0xff] }
  0x2a   :  { %737 = vmatprep.subr.mxu1 %v118_v17  ;;  %700 = vmatpush3.msra.mxu0 %v70_v18  ;;  %v100_v27 = vld [vmem:[#allocation5 + $0x148] sm:$0xff]  ;;  %v99_v34 = vld [vmem:[#allocation5 + $0x140] sm:$0xff]  ;;  %v66_v37 = vld [vmem:[#allocation5 + $0x38] sm:$0xff] }
  0x2b   :  { %738 = vmatpush3.msra.mxu1 %v102_v19  ;;  %701 = vmatprep.subr.mxu0 %v85_v20  ;;  %v98_v38 = vld [vmem:[#allocation5 + $0x138] sm:$0xff]  ;;  %v81_v39 = vld [vmem:[#allocation5 + $0xb0] sm:$0xff]  ;;  %v80_v45 = vld [vmem:[#allocation5 + $0xa8] sm:$0xff] }
  0x2c   :  { %739 = vmatprep.subr.mxu1 %v117_v21  ;;  %702 = vmatpush3.msra.mxu0 %v69_v22  ;;  %v113_v40 = vld [vmem:[#allocation5 + $0x1b0] sm:$0xff]  ;;  %v112_v46 = vld [vmem:[#allocation5 + $0x1a8] sm:$0xff]  ;;  %v79_v49 = vld [vmem:[#allocation5 + $0xa0] sm:$0xff] }
  0x2d   :  { %740 = vmatpush3.msra.mxu1 %v101_v23  ;;  %703 = vmatprep.subr.mxu0 %v84_v24  ;;  %v65_v43 = vld [vmem:[#allocation5 + $0x30] sm:$0xff]  ;;  %v64_v47 = vld [vmem:[#allocation5 + $0x28] sm:$0xff]  ;;  %v111_v50 = vld [vmem:[#allocation5 + $0x1a0] sm:$0xff] }
  0x2e   :  { %741 = vmatprep.subr.mxu1 %v116_v25  ;;  %704 = vmatpush3.msra.mxu0 %v68_v26  ;;  %v97_v44 = vld [vmem:[#allocation5 + $0x130] sm:$0xff]  ;;  %v96_v48 = vld [vmem:[#allocation5 + $0x128] sm:$0xff]  ;;  %v63_v51 = vld [vmem:[#allocation5 + $0x20] sm:$0xff] }
  0x2f   :  { %742 = vmatpush3.msra.mxu1 %v100_v27  ;;  %705 = vmatprep.subr.mxu0 %v83_v28  ;;  %v95_v52 = vld [vmem:[#allocation5 + $0x120] sm:$0xff]  ;;  %v78_v53 = vld [vmem:[#allocation5 + $0x98] sm:$0xff]  ;;  %v77_v62 = vld [vmem:[#allocation5 + $0x90] sm:$0xff] }
  0x30   :  { %743 = vmatprep.subr.mxu1 %v115_v29  ;;  %706 = vmatpush3.msra.mxu0 %v67_v33  ;;  %v110_v54 = vld [vmem:[#allocation5 + $0x198] sm:$0xff]  ;;  %v853_v57 = vld [vmem:[#allocation2] ss:$16 sps:$4 sm:$0xff]   ;;  %v857_v60 = vld [vmem:[#allocation2 + $0x4] ss:$16 sps:$4 sm:$0xff]  }
  0x31   :  { %744 = vmatpush3.msra.mxu1 %v99_v34  ;;  %707 = vmatprep.subr.mxu0 %v82_v35  ;;  %v62_v56 = vld [vmem:[#allocation5 + $0x18] sm:$0xff]  ;;  %v855_v58 = vld [vmem:[#allocation2 + $0x20] ss:$16 sps:$4 sm:$0xff]   ;;  %v858_v61 = vld [vmem:[#allocation2 + $0x24] ss:$16 sps:$4 sm:$0xff]   ;;  %v220_v0 = vrot.slane %v853_v57, %v979_v55  ;;  %v227_v6 = vrot.slane %v857_v60, %v979_v55 }
  0x32   :  { %745 = vmatprep.subr.mxu1 %v114_v36  ;;  %708 = vmatpush3.msra.mxu0 %v66_v37  ;;  %v94_v59 = vld [vmem:[#allocation5 + $0x118] sm:$0xff]  ;;  %v109_v63 = vld [vmem:[#allocation5 + $0x190] sm:$0xff]  ;;  %v234_v1 = vrot.slane %v855_v58, %v979_v55  ;;  %v76_v4 = vld [vmem:[#allocation5 + $0x88] sm:$0xff]  ;;  %v241_v7 = vrot.slane %v858_v61, %v979_v55 }
  0x33   :  { %746 = vmatpush3.msra.mxu1 %v98_v38  ;;  %709 = vmatprep.subr.mxu0 %v81_v39  ;;  %v61_v2 = vld [vmem:[#allocation5 + $0x10] sm:$0xff]  ;;  %v108_v5 = vld [vmem:[#allocation5 + $0x188] sm:$0xff]  ;;  %v75_v10 = vld [vmem:[#allocation5 + $0x80] sm:$0xff] }
  0x34   :  { %747 = vmatprep.subr.mxu1 %v113_v40  ;;  %710 = vmatpush3.msra.mxu0 %v65_v43  ;;  %v93_v3 = vld [vmem:[#allocation5 + $0x110] sm:$0xff]  ;;  %v60_v8 = vld [vmem:[#allocation5 + $0x8] sm:$0xff]  ;;  %v107_v11 = vld [vmem:[#allocation5 + $0x180] sm:$0xff]  ;;  %v243_v12 = vcombine.high %v220_v0, %v234_v1  ;;  %v242_v14 = vcombine.low %v220_v0, %v234_v1  ;;  %v245_v16 = vcombine.high %v227_v6, %v241_v7 }
  0x35   :  { %748 = vmatpush3.msra.mxu1 %v97_v44  ;;  %711 = vmatprep.subr.mxu0 %v80_v45  ;;  %v92_v9 = vld [vmem:[#allocation5 + $0x108] sm:$0xff]  ;;  %v59_v13 = vld [vmem:[#allocation5] sm:$0xff]  ;;  %v154_v17 = vld [vmem:[#allocation5 + $0x2f8] sm:$0xff]  ;;  %v244_v18 = vcombine.low %v227_v6, %v241_v7 }
  0x36   :  { %749 = vmatprep.subr.mxu1 %v112_v46  ;;  %712 = vmatpush3.msra.mxu0 %v64_v47  ;;  %v91_v15 = vld [vmem:[#allocation5 + $0x100] sm:$0xff]  ;;  %v186_v19 = vld [vmem:[#allocation5 + $0x3f8] sm:$0xff]  ;;  %v153_v22 = vld [vmem:[#allocation5 + $0x2f0] sm:$0xff] }
  0x37   :  { %750 = vmatpush3.msra.mxu1 %v96_v48  ;;  %713 = vmatprep.subr.mxu0 %v79_v49  ;;  %v138_v20 = vld [vmem:[#allocation5 + $0x278] sm:$0xff]  ;;  %v185_v23 = vld [vmem:[#allocation5 + $0x3f0] sm:$0xff]  ;;  %v152_v26 = vld [vmem:[#allocation5 + $0x2e8] sm:$0xff] }
  0x38   :  { %751 = vmatprep.subr.mxu1 %v111_v50  ;;  %714 = vmatpush3.msra.mxu0 %v63_v51  ;;  %v170_v21 = vld [vmem:[#allocation5 + $0x378] sm:$0xff]  ;;  %v137_v24 = vld [vmem:[#allocation5 + $0x270] sm:$0xff]  ;;  %v184_v27 = vld [vmem:[#allocation5 + $0x3e8] sm:$0xff] }
  0x39   :  { %752 = vmatpush3.msra.mxu1 %v95_v52  ;;  %715 = vmatprep.subr.mxu0 %v78_v53  ;;  %v169_v25 = vld [vmem:[#allocation5 + $0x370] sm:$0xff]  ;;  %v136_v28 = vld [vmem:[#allocation5 + $0x268] sm:$0xff]  ;;  %v151_v30 = vld [vmem:[#allocation5 + $0x2e0] sm:$0xff] }
  0x3a   :  { %753 = vmatprep.subr.mxu1 %v110_v54  ;;  %716 = vmatpush3.msra.mxu0 %v62_v56  ;;  %v168_v29 = vld [vmem:[#allocation5 + $0x368] sm:$0xff]  ;;  %v183_v31 = vld [vmem:[#allocation5 + $0x3e0] sm:$0xff]  ;;  %v150_v34 = vld [vmem:[#allocation5 + $0x2d8] sm:$0xff] }
  0x3b   :  { %754 = vmatpush3.msra.mxu1 %v94_v59  ;;  %717 = vmatprep.subr.mxu0 %v77_v62  ;;  %v135_v32 = vld [vmem:[#allocation5 + $0x260] sm:$0xff]  ;;  %v182_v35 = vld [vmem:[#allocation5 + $0x3d8] sm:$0xff]  ;;  %v149_v38 = vld [vmem:[#allocation5 + $0x2d0] sm:$0xff] }
  0x3c   :  { %755 = vmatprep.subr.mxu1 %v109_v63  ;;  %718 = vmatpush3.msra.mxu0 %v61_v2  ;;  %v167_v33 = vld [vmem:[#allocation5 + $0x360] sm:$0xff]  ;;  %v134_v36 = vld [vmem:[#allocation5 + $0x258] sm:$0xff]  ;;  %v181_v39 = vld [vmem:[#allocation5 + $0x3d0] sm:$0xff] }
  0x3d   :  { %756 = vmatpush3.msra.mxu1 %v93_v3  ;;  %719 = vmatprep.subr.mxu0 %v76_v4  ;;  %v166_v37 = vld [vmem:[#allocation5 + $0x358] sm:$0xff]  ;;  %v133_v40 = vld [vmem:[#allocation5 + $0x250] sm:$0xff]  ;;  %v148_v42 = vld [vmem:[#allocation5 + $0x2c8] sm:$0xff] }
  0x3e   :  { %757 = vmatprep.subr.mxu1 %v108_v5  ;;  %720 = vmatpush3.msra.mxu0 %v60_v8  ;;  %v165_v41 = vld [vmem:[#allocation5 + $0x350] sm:$0xff]  ;;  %v180_v43 = vld [vmem:[#allocation5 + $0x3c8] sm:$0xff]  ;;  %v147_v46 = vld [vmem:[#allocation5 + $0x2c0] sm:$0xff] }
  0x3f   :  { %758 = vmatpush3.msra.mxu1 %v92_v9  ;;  %721 = vmatprep.subr.mxu0 %v75_v10  ;;  %v132_v44 = vld [vmem:[#allocation5 + $0x248] sm:$0xff]  ;;  %v179_v47 = vld [vmem:[#allocation5 + $0x3c0] sm:$0xff]  ;;  %v146_v50 = vld [vmem:[#allocation5 + $0x2b8] sm:$0xff] }
  0x40   :  { %759 = vmatprep.subr.mxu1 %v107_v11  ;;  %722 = vmatpush3.msra.mxu0 %v59_v13  ;;  %v164_v45 = vld [vmem:[#allocation5 + $0x348] sm:$0xff]  ;;  %v131_v48 = vld [vmem:[#allocation5 + $0x240] sm:$0xff]  ;;  %v178_v51 = vld [vmem:[#allocation5 + $0x3b8] sm:$0xff] }
  0x41   :  { %434 = vmatprep.mubr.f32.mxu0 %v243_v12  ;;  %760 = vmatpush3.msra.mxu1 %v91_v15  ;;  %v163_v49 = vld [vmem:[#allocation5 + $0x340] sm:$0xff]  ;;  %v130_v52 = vld [vmem:[#allocation5 + $0x238] sm:$0xff]  ;;  %v145_v57 = vld [vmem:[#allocation5 + $0x2b0] sm:$0xff] }
  0x42   :  { %435 = vmatmul.mubr.f32.vlgmr.msra.gmra.mxu0 %v242_v14  ;;  %509 = vmatprep.mubr.f32.mxu1 %v245_v16  ;;  %v162_v53 = vld [vmem:[#allocation5 + $0x338] sm:$0xff]  ;;  %v859_v54 = vld [vmem:[#allocation2 + $0x40] ss:$16 sps:$4 sm:$0xff]   ;;  %v863_v61 = vld [vmem:[#allocation2 + $0x44] ss:$16 sps:$4 sm:$0xff]  }
  0x43   :  { %767 = vmatprep.subr.mxu0 %v154_v17  ;;  %805 = vmatprep.subr.mxu1 %v186_v19  ;;  %v861_v56 = vld [vmem:[#allocation2 + $0x60] ss:$16 sps:$4 sm:$0xff]   ;;  %v864_v62 = vld [vmem:[#allocation2 + $0x64] ss:$16 sps:$4 sm:$0xff]   ;;  %v144_v63 = vld [vmem:[#allocation5 + $0x2a8] sm:$0xff]  ;;  %v292_v1 = vrot.slane %v859_v54, %v979_v55  ;;  %v299_v11 = vrot.slane %v863_v61, %v979_v55 }
  0x44   :  { %510 = vmatmul.mubr.f32.vlgmr.msra.gmra.mxu1 %v244_v18  ;;  %768 = vmatpush3.msra.mxu0 %v138_v20  ;;  %v177_v58 = vld [vmem:[#allocation5 + $0x3b0] sm:$0xff]  ;;  %v176_v0 = vld [vmem:[#allocation5 + $0x3a8] sm:$0xff]  ;;  %v306_v2 = vrot.slane %v861_v56, %v979_v55  ;;  %v143_v5 = vld [vmem:[#allocation5 + $0x2a0] sm:$0xff]  ;;  %v313_v12 = vrot.slane %v864_v62, %v979_v55 }
  0x45   :  { %806 = vmatpush3.msra.mxu1 %v170_v21  ;;  %769 = vmatprep.subr.mxu0 %v153_v22  ;;  %v129_v59 = vld [vmem:[#allocation5 + $0x230] sm:$0xff]  ;;  %v128_v3 = vld [vmem:[#allocation5 + $0x228] sm:$0xff]  ;;  %v175_v6 = vld [vmem:[#allocation5 + $0x3a0] sm:$0xff] }
  0x46   :  { %807 = vmatprep.subr.mxu1 %v185_v23  ;;  %770 = vmatpush3.msra.mxu0 %v137_v24  ;;  %v161_v60 = vld [vmem:[#allocation5 + $0x330] sm:$0xff]  ;;  %v160_v4 = vld [vmem:[#allocation5 + $0x328] sm:$0xff]  ;;  %v127_v7 = vld [vmem:[#allocation5 + $0x220] sm:$0xff]  ;;  %v315_v13 = vcombine.high %v292_v1, %v306_v2  ;;  %v314_v18 = vcombine.low %v292_v1, %v306_v2  ;;  %v317_v24 = vcombine.high %v299_v11, %v313_v12 }
  0x47   :  { %808 = vmatpush3.msra.mxu1 %v169_v25  ;;  %771 = vmatprep.subr.mxu0 %v152_v26  ;;  %v159_v8 = vld [vmem:[#allocation5 + $0x320] sm:$0xff]  ;;  %v142_v9 = vld [vmem:[#allocation5 + $0x298] sm:$0xff]  ;;  %v141_v21 = vld [vmem:[#allocation5 + $0x290] sm:$0xff] }
  0x48   :  { %809 = vmatprep.subr.mxu1 %v184_v27  ;;  %772 = vmatpush3.msra.mxu0 %v136_v28  ;;  %v174_v10 = vld [vmem:[#allocation5 + $0x398] sm:$0xff]  ;;  %v173_v22 = vld [vmem:[#allocation5 + $0x390] sm:$0xff]  ;;  %v690_v62 = vld [vmem:[%s1005_s2] ss:$0 sm:$0xff] }
  0x49   :  { %810 = vmatpush3.msra.mxu1 %v168_v29  ;;  %773 = vmatprep.subr.mxu0 %v151_v30  ;;  %v126_v14 = vld [vmem:[#allocation5 + $0x218] sm:$0xff]  ;;  %v125_v28 = vld [vmem:[#allocation5 + $0x210] sm:$0xff] }
  0x4a   :  { %811 = vmatprep.subr.mxu1 %v183_v31  ;;  %774 = vmatpush3.msra.mxu0 %v135_v32  ;;  %v865_v15 = vld [vmem:[#allocation2 + $0x8] ss:$16 sps:$4 sm:$0xff]   ;;  %v869_v19 = vld [vmem:[#allocation2 + $0xc] ss:$16 sps:$4 sm:$0xff]   ;;  %v157_v31 = vld [vmem:[#allocation5 + $0x310] sm:$0xff]  ;;  %v316_v32 = vcombine.low %v299_v11, %v313_v12 }
  0x4b   :  { %812 = vmatpush3.msra.mxu1 %v167_v33  ;;  %775 = vmatprep.subr.mxu0 %v150_v34  ;;  %v867_v16 = vld [vmem:[#allocation2 + $0x28] ss:$16 sps:$4 sm:$0xff]   ;;  %v870_v20 = vld [vmem:[#allocation2 + $0x2c] ss:$16 sps:$4 sm:$0xff]   ;;  %v256_v29 = vrot.slane %v865_v15, %v979_v55  ;;  %v263_v34 = vrot.slane %v869_v19, %v979_v55 }
  0x4c   :  { %813 = vmatprep.subr.mxu1 %v182_v35  ;;  %776 = vmatpush3.msra.mxu0 %v134_v36  ;;  %v158_v17 = vld [vmem:[#allocation5 + $0x318] sm:$0xff]  ;;  %v270_v30 = vrot.slane %v867_v16, %v979_v55  ;;  %v140_v33 = vld [vmem:[#allocation5 + $0x288] sm:$0xff]  ;;  %v277_v35 = vrot.slane %v870_v20, %v979_v55 }
  0x4d   :  { %814 = vmatpush3.msra.mxu1 %v166_v37  ;;  %777 = vmatprep.subr.mxu0 %v149_v38  ;;  %v871_v23 = vld [vmem:[#allocation2 + $0x48] ss:$16 sps:$4 sm:$0xff]   ;;  %v875_v26 = vld [vmem:[#allocation2 + $0x4c] ss:$16 sps:$4 sm:$0xff]  }
  0x4e   :  { %815 = vmatprep.subr.mxu1 %v181_v39  ;;  %778 = vmatpush3.msra.mxu0 %v133_v40  ;;  %v873_v25 = vld [vmem:[#allocation2 + $0x68] ss:$16 sps:$4 sm:$0xff]   ;;  %v876_v27 = vld [vmem:[#allocation2 + $0x6c] ss:$16 sps:$4 sm:$0xff]   ;;  %v328_v37 = vrot.slane %v871_v23, %v979_v55 }
  0x4f   :  { %816 = vmatpush3.msra.mxu1 %v165_v41  ;;  %779 = vmatprep.subr.mxu0 %v148_v42  ;;  %v172_v36 = vld [vmem:[#allocation5 + $0x388] sm:$0xff]  ;;  %v342_v40 = vrot.slane %v873_v25, %v979_v55  ;;  %v335_v41 = vrot.slane %v875_v26, %v979_v55  ;;  %v349_v42 = vrot.slane %v876_v27, %v979_v55 }
  0x50   :  { %817 = vmatprep.subr.mxu1 %v180_v43  ;;  %780 = vmatpush3.msra.mxu0 %v132_v44  ;;  %v124_v38 = vld [vmem:[#allocation5 + $0x208] sm:$0xff]  ;;  %v139_v43 = vld [vmem:[#allocation5 + $0x280] sm:$0xff] }
  0x51   :  { %818 = vmatpush3.msra.mxu1 %v164_v45  ;;  %781 = vmatprep.subr.mxu0 %v147_v46  ;;  %v156_v39 = vld [vmem:[#allocation5 + $0x308] sm:$0xff]  ;;  %v171_v44 = vld [vmem:[#allocation5 + $0x380] sm:$0xff]  ;;  %v279_v45 = vcombine.high %v256_v29, %v270_v30  ;;  %v350_v55 = vcombine.low %v328_v37, %v342_v40 }
  0x52   :  { %819 = vmatprep.subr.mxu1 %v179_v47  ;;  %782 = vmatpush3.msra.mxu0 %v131_v48  ;;  %v123_v46 = vld [vmem:[#allocation5 + $0x200] sm:$0xff]  ;;  %v281_v47 = vcombine.high %v263_v34, %v277_v35  ;;  %v278_v48 = vcombine.low %v256_v29, %v270_v30 }
  0x53   :  { %820 = vmatpush3.msra.mxu1 %v163_v49  ;;  %783 = vmatprep.subr.mxu0 %v146_v50  ;;  %v155_v49 = vld [vmem:[#allocation5 + $0x300] sm:$0xff]  ;;  %v280_v50 = vcombine.low %v263_v34, %v277_v35 }
  0x54   :  { %821 = vmatprep.subr.mxu1 %v178_v51  ;;  %784 = vmatpush3.msra.mxu0 %v130_v52  ;;  %v351_v51 = vcombine.high %v328_v37, %v342_v40  ;;  %v353_v52 = vcombine.high %v335_v41, %v349_v42 }
  0x55   :  { %822 = vmatpush3.msra.mxu1 %v162_v53  ;;  %785 = vmatprep.subr.mxu0 %v145_v57  ;;  %v352_v53 = vcombine.low %v335_v41, %v349_v42 }
  0x56   :  { %823 = vmatprep.subr.mxu1 %v177_v58  ;;  %786 = vmatpush3.msra.mxu0 %v129_v59 }
  0x57   :  { %824 = vmatpush3.msra.mxu1 %v161_v60  ;;  %787 = vmatprep.subr.mxu0 %v144_v63 }
  0x58   :  { %825 = vmatprep.subr.mxu1 %v176_v0  ;;  %788 = vmatpush3.msra.mxu0 %v128_v3 }
  0x59   :  { %826 = vmatpush3.msra.mxu1 %v160_v4  ;;  %789 = vmatprep.subr.mxu0 %v143_v5 }
  0x5a   :  { %827 = vmatprep.subr.mxu1 %v175_v6  ;;  %790 = vmatpush3.msra.mxu0 %v127_v7 }
  0x5b   :  { %828 = vmatpush3.msra.mxu1 %v159_v8  ;;  %791 = vmatprep.subr.mxu0 %v142_v9 }
  0x5c   :  { %829 = vmatprep.subr.mxu1 %v174_v10  ;;  %439 = vmatprep.mubr.f32.mxu0 %v315_v13 }
  0x5d   :  { %792 = vmatpush3.msra.mxu0 %v126_v14  ;;  %830 = vmatpush3.msra.mxu1 %v158_v17 }
  0x5e   :  { %440 = vmatmul.mubr.f32.gmra.mxu0 %v314_v18  ;;  %793 = vmatprep.subr.mxu0 %v141_v21 }
  0x5f   :  { %831 = vmatprep.subr.mxu1 %v173_v22  ;;  %514 = vmatprep.mubr.f32.mxu1 %v317_v24 }
  0x60   :  { %794 = vmatpush3.msra.mxu0 %v125_v28  ;;  %832 = vmatpush3.msra.mxu1 %v157_v31 }
  0x61   :  { %795 = vmatprep.subr.mxu0 %v140_v33  ;;  %515 = vmatmul.mubr.f32.gmra.mxu1 %v316_v32 }
  0x62   :  { %833 = vmatprep.subr.mxu1 %v172_v36  ;;  %796 = vmatpush3.msra.mxu0 %v124_v38 }
  0x63   :  { %834 = vmatpush3.msra.mxu1 %v156_v39  ;;  %797 = vmatprep.subr.mxu0 %v139_v43 }
  0x64   :  { %835 = vmatprep.subr.mxu1 %v171_v44  ;;  %798 = vmatpush3.msra.mxu0 %v123_v46 }
  0x65   :  { %584 = vmatprep.mubr.f32.mxu0 %v279_v45  ;;  %836 = vmatpush3.msra.mxu1 %v155_v49 }
  0x66   :  { %659 = vmatprep.mubr.f32.mxu1 %v281_v47  ;;  %585 = vmatmul.mubr.f32.vlgmr.msra.gmra.mxu0 %v278_v48 }
  0x67   :  { %660 = vmatmul.mubr.f32.vlgmr.msra.gmra.mxu1 %v280_v50  ;;  %589 = vmatprep.mubr.f32.mxu0 %v351_v51 }
  0x68   :  { %664 = vmatprep.mubr.f32.mxu1 %v353_v52 }
  0x6a   :  { %590 = vmatmul.mubr.f32.gmra.mxu0 %v350_v55 }
  0x6b   :  { %665 = vmatmul.mubr.f32.gmra.mxu1 %v352_v53 }
 0x102   :  { %v723_v54 = vpop.f32.mrf.mxu0 }
 0x104   :  { %v761_v56 = vpop.f32.mrf.mxu1  ;;  %v724_v57 = vpop.f32.mrf.mxu0 }
 0x105   :  { %v725_v60 = vadd.f32 %v724_v57, %v723_v54 }
 0x106   :  { %v762_v59 = vpop.f32.mrf.mxu1 }
 0x107   :  { %v437_v1 = vadd.f32 %v725_v60, %v690_v62  ;;  %v763_v2 = vadd.f32 %v762_v59, %v761_v56 }
 0x109   :  { %v512_v8 = vadd.f32 %v763_v2, %v437_v1 }
 0x11e   :  { %v726_v58 = vpop.f32.mrf.mxu0 }
 0x120   :  { %v727_v63 = vpop.f32.mrf.mxu0 }
 0x121   :  { %v764_v61 = vpop.f32.mrf.mxu1  ;;  %v728_v3 = vadd.f32 %v727_v63, %v726_v58 }
 0x123   :  { %v765_v0 = vpop.f32.mrf.mxu1  ;;  %v442_v9 = vadd.f32 %v728_v3, %v690_v62 }
 0x124   :  { %v766_v10 = vadd.f32 %v765_v0, %v764_v61 }
 0x126   :  { %v799_v4 = vpop.f32.mrf.mxu0  ;;  %v517_v18 = vadd.f32 %v766_v10, %v442_v9 }
 0x127   :  { %v837_v5 = vpop.f32.mrf.mxu1 }
 0x128   :  { %v800_v6 = vpop.f32.mrf.mxu0 }
 0x129   :  { %v838_v7 = vpop.f32.mrf.mxu1  ;;  %v801_v11 = vadd.f32 %v800_v6, %v799_v4 }
 0x12a   :  { %v802_v12 = vpop.f32.mrf.mxu0  ;;  %v839_v15 = vadd.f32 %v838_v7, %v837_v5 }
 0x12b   :  { %v840_v13 = vpop.f32.mrf.mxu1  ;;  %v587_v14 = vadd.f32 %v801_v11, %v512_v8 }
 0x12c   :  { %v803_v16 = vpop.f32.mrf.mxu0 }
 0x12d   :  { %v841_v17 = vpop.f32.mrf.mxu1  ;;  %v662_v19 = vadd.f32 %v839_v15, %v587_v14  ;;  %v804_v20 = vadd.f32 %v803_v16, %v802_v12 }
 0x12e   :  { %v842_v22 = vadd.f32 %v841_v17, %v840_v13 }
 0x12f   :  { %670 = vst [vmem:[#allocation7] sm:$0xff] %v662_v19  ;;  %v592_v21 = vadd.f32 %v804_v20, %v517_v18 }
 0x131   :  { %v667_v23 = vadd.f32 %v842_v22, %v592_v21 }
 0x133   :  { %671 = vst [vmem:[#allocation7 + $0x8] sm:$0xff] %v667_v23 }
 0x134   :  { %676 = vsyncadd [#allocation4], 224  ;;  %s950_s2 = smov [#allocation7]  }
 0x135   :  { %s677_s27 = sshll.u32 %s950_s2, 4  ;;  %s678_s27 = int_to_ptr.vmem [resolvable:$true] %s677_s27 }
 0x136   :  { %s917_s28 = scalar_lea.vmem %s678_s27, 32  ;;  %s921_s29 = scalar_lea.vmem %s678_s27, 256 }
 0x137   :  { %p918_p10 = scmp.ne.s32.totalorder %s678_s27, %s917_s28  ;;  %p922_p11 = scmp.lt.s32.totalorder %s678_s27, %s678_s27 }
 0x138   :  { %p923_p12 = scmp.lt.s32.totalorder %s921_s29, %s917_s28 }
 0x13a   :  { %p924_p13 = por %p923_p12, %p922_p11 }
 0x13c   :  { %p925_p0 = pnand %p924_p13, %p918_p10 }
 0x13e   :  { %928 = shalt.err (!%p925_p0)
}
 0x13f   :  { %s951_s30 = smov 32   ;;  %s952_s4 = smov 2  }
 0x140   :  { %683 = dma.vmem_to_hbm [thread:$0]  %s678_s27, 32, %s1006_s3, [#allocation4], %s951_s30, %s951_s30, %s952_s4  }
 0x141   :  { %941 = dma.done.wait [#allocation4], 256  }
 0x142   :  { %942 = vsyncadd [#allocation4], 4294967040 }
 0x143   :  { %687 = vsyncpa [#allocation3], 1 }
 0x144   :  { %688 = vsyncpa [#allocation6], 1 }
 0x145   :  { %689 = vsyncpa [#allocation4], 1 }

</bundles_post_ra>
